<compile_context>
chip_gen: v6e
topology: v6e:2x2x1
jax: 0.10.0
libtpu: 0.0.40
codegen_flags: <defaults>
</compile_context>

<pallas_src>
import jax
import jax.numpy as jnp
from jax import lax
from jax.experimental import pallas as pl
from jax.experimental.pallas import tpu as pltpu


def distmat_kernel(x_ref, w1_ref, b1_ref, w2_ref, b2_ref, out_ref, y_ref, arow_ref):
    # x_ref:    (S, H)      per-batch activation slab (batch dim squeezed)
    # w1_ref:   (DM, H)     linear1 weight, native PyTorch (out, in) layout
    # b1_ref:   (1, DM)     linear1 bias
    # w2_ref:   (C, DM)     linear2 weight, native PyTorch (out, in) layout
    # b2_ref:   (C, 1)      linear2 bias (column vector)
    # out_ref:  (C, tS, S)  per-(batch, row-block) log-probs, class axis leading
    # y_ref:    (S, DM)     scratch: linear1 output, persists across row blocks
    # arow_ref: (C, S)      scratch: sum_k w2[c,k]*y[j,k]^2 + b2[c]
    rb = pl.program_id(1)
    C, tS, S = out_ref.shape
    DM = w2_ref.shape[1]

    contract_last = (((1,), (1,)), ((), ()))  # contract dim 1 of both operands

    @pl.when(rb == 0)
    def _():
        # y = x @ w1.T + b1, computed once per batch, reused by every row block.
        y = (lax.dot_general(x_ref[...], w1_ref[...], contract_last,
                             preferred_element_type=jnp.float32)
             + b1_ref[...])                                                # (S, DM)
        y_ref[...] = y
        # a_row[c, j] = sum_k w2[c,k] * y[j,k]^2 + b2[c]
        arow_ref[...] = (lax.dot_general(w2_ref[...], y * y, contract_last,
                                         preferred_element_type=jnp.float32)
                         + b2_ref[...])                                    # (C, S)

    y = y_ref[...]                                           # (S, DM)  all columns
    row0 = pl.multiple_of(rb * tS, 8)
    yq = y_ref[pl.ds(row0, tS), :]                           # (tS, DM) query rows

    w2 = w2_ref[...]                                         # (C, DM)

    # logit[c, i, j] = sum_k (yq[i,k] - y[j,k])^2 * w2[c,k] + b2[c]
    #               = a_col[c, i] + a_row[c, j] - 2 * ((yq * w2_c) @ y^T)[i, j]
    # a_col as (C, tS, 1): elementwise multiply + lane reduce (keepdims).
    yqsq = yq * yq                                                             # (tS, DM)
    a_col = jnp.sum(w2[:, None, :] * yqsq[None, :, :], axis=-1, keepdims=True)  # (C, tS, 1)

    # Stacked cross term: ONE (C*tS, DM) @ (DM, S) matmul instead of C tiny ones.
    # The -2 factor is folded into the small (C, DM) operand, not the big result.
    yw = (yq[None, :, :] * (-2.0 * w2)[:, None, :]).reshape(C * tS, DM)
    cross = lax.dot_general(yw, y, contract_last,
                            preferred_element_type=jnp.float32).reshape(C, tS, S)

    logits = cross + a_col + arow_ref[...][:, None, :]                         # (C, tS, S)

    # Numerically stable log-softmax across the class (leading) axis:
    # whole-vreg VPU/EUP work, one store for all classes.
    m = jnp.max(logits, axis=0, keepdims=True)
    shifted = logits - m
    lse = jnp.log(jnp.sum(jnp.exp(shifted), axis=0, keepdims=True))
    out_ref[...] = (shifted - lse).astype(out_ref.dtype)


def _pick_row_block(S, C, out_block_budget_bytes=4 * 1024 * 1024):
    """Largest row tile (multiple of 8, dividing S) whose (C, tS, S) f32 output
    block stays under the per-buffer budget; falls back to the full S."""
    if S % 8 != 0:
        return S
    best = 8
    for tS in range(8, S + 1, 8):
        if S % tS == 0 and C * tS * S * 4 <= out_block_budget_bytes:
            best = tS
    return best


def _default_vmem_limit_bytes():
    # ~3/4 of physical VMEM per TensorCore (64 MiB on v7x, 128 MiB on v5e/v6e),
    # capped at 96 MiB; conservative 48 MiB fallback if the query is unavailable.
    try:
        cap = int(getattr(pltpu.get_tpu_info(), "vmem_capacity_bytes",
                          64 * 1024 * 1024))
        return min(max(cap * 3 // 4, 32 * 1024 * 1024), 96 * 1024 * 1024)
    except Exception:
        return 48 * 1024 * 1024


def distmat_prediction(x, w1, b1, w2, b2, *, row_block=None, vmem_limit_bytes=None):
    """
    x:  (N, S, H) float32   -- BERT encoder output
    w1: (DM, H)   float32   -- linear1 weight (PyTorch out x in)
    b1: (DM,)     float32
    w2: (C, DM)   float32   -- linear2 weight (PyTorch out x in), C = vocab3d - 4
    b2: (C,)      float32
    returns (N, C, S, S) float32 log-probs (== PyTorch dist_mat.transpose(1, 3))
    """
    N, S, H = x.shape
    DM = w1.shape[0]
    C = w2.shape[0]

    if row_block is None:
        row_block = _pick_row_block(S, C)
    tS = int(row_block)
    assert S % tS == 0, f"row_block {tS} must divide S {S}"
    R = S // tS

    if vmem_limit_bytes is None:
        vmem_limit_bytes = _default_vmem_limit_bytes()

    b1r = b1.reshape(1, DM)   # (1, DM) glue
    b2r = b2.reshape(C, 1)    # (C, 1)  glue

    flops = N * (
        2 * S * H * DM                 # linear1 (once per batch)
        + 2 * C * S * DM               # a_row (once per batch)
        + 2 * C * S * DM               # a_col (summed over row blocks)
        + 2 * C * S * S * DM           # stacked cross matmul
        + 10 * C * S * S               # elementwise epilogue (approx)
    )
    cost = pl.CostEstimate(
        flops=int(flops),
        transcendentals=int(N * S * S * (C + 1)),
        bytes_accessed=int((N * S * H + DM * H + DM + C * DM + C
                            + N * C * S * S) * 4),
    )

    return pl.pallas_call(
        distmat_kernel,
        out_shape=jax.ShapeDtypeStruct((N, C, S, S), jnp.float32),
        grid_spec=pltpu.PrefetchScalarGridSpec(
            num_scalar_prefetch=0,
            grid=(N, R),
            in_specs=[
                pl.BlockSpec((None, S, H), lambda n, r: (n, 0, 0)),  # per-batch x slab
                pl.BlockSpec((DM, H), lambda n, r: (0, 0)),          # linear1 weight
                pl.BlockSpec((1, DM), lambda n, r: (0, 0)),          # linear1 bias
                pl.BlockSpec((C, DM), lambda n, r: (0, 0)),          # linear2 weight
                pl.BlockSpec((C, 1), lambda n, r: (0, 0)),           # linear2 bias
            ],
            out_specs=pl.BlockSpec((None, C, tS, S), lambda n, r: (n, 0, r, 0)),
            scratch_shapes=[
                pltpu.VMEM((S, DM), jnp.float32),   # y = linear1(x)
                pltpu.VMEM((C, S), jnp.float32),    # a_row + b2
            ],
        ),
        compiler_params=pltpu.CompilerParams(
            dimension_semantics=("parallel", "arbitrary"),
            vmem_limit_bytes=int(vmem_limit_bytes),
        ),
        cost_estimate=cost,
    )(x, w1, b1r, w2, b2r)


def reference(x, w1, b1, w2, b2):
    # Mirrors DistMatPrediction.forward exactly.
    y = x @ w1.T + b1                                        # (N, S, DM)
    d = (y[:, :, None, :] - y[:, None, :, :]) ** 2           # (N, S, S, DM)
    logits = d @ w2.T + b2                                   # (N, S, S, C)
    logp = jax.nn.log_softmax(logits, axis=-1)
    return jnp.transpose(logp, (0, 3, 2, 1))                 # torch .transpose(1, 3)


def _make_inputs(key, N, S, H, DM, C):
    kx, k1, k2, k3, k4 = jax.random.split(key, 5)
    x = jax.random.normal(kx, (N, S, H), dtype=jnp.float32)
    w1 = jax.random.normal(k1, (DM, H), dtype=jnp.float32) * 0.1
    b1 = jax.random.normal(k2, (DM,), dtype=jnp.float32) * 0.1
    w2 = jax.random.normal(k3, (C, DM), dtype=jnp.float32) * 0.1
    b2 = jax.random.normal(k4, (C,), dtype=jnp.float32) * 0.1
    return x, w1, b1, w2, b2


if __name__ == "__main__":
    # Test 1: toy shapes (single row block per batch).
    N, S, H = 2, 8, 32          # batch, seq_len, hidden
    DM = 16                     # dm_hidden
    C = 10 - 4                  # d_size = relative_3d_vocab_size - 4
    x, w1, b1, w2, b2 = _make_inputs(jax.random.PRNGKey(0), N, S, H, DM, C)

    out = jax.block_until_ready(distmat_prediction(x, w1, b1, w2, b2))
    ref = reference(x, w1, b1, w2, b2)
    assert out.shape == (N, C, S, S)
    err = float(jnp.max(jnp.abs(out - ref)))
    assert jnp.allclose(out, ref, atol=1e-4, rtol=1e-4), err

    # Test 2: larger shapes exercising the row-block grid axis, the y/a_row
    # scratch reuse across row blocks, and real (8, 128) tiling.
    N2, S2, H2, DM2, C2 = 2, 128, 128, 16, 6
    x2, w12, b12, w22, b22 = _make_inputs(jax.random.PRNGKey(1), N2, S2, H2, DM2, C2)
    out2 = jax.block_until_ready(
        distmat_prediction(x2, w12, b12, w22, b22, row_block=32))
    ref2 = reference(x2, w12, b12, w22, b22)
    assert out2.shape == (N2, C2, S2, S2)
    err2 = float(jnp.max(jnp.abs(out2 - ref2)))
    assert jnp.allclose(out2, ref2, atol=1e-3, rtol=1e-3), err2

    print("KERNEL_OK")
</pallas_src>

<mosaic_0001>
module attributes {stable_mosaic.version = 11 : i64} {
  func.func @distmat_kernel(%arg0: i32, %arg1: i32, %arg2: memref<1x8x32xf32, #tpu.memory_space<vmem>>, %arg3: memref<16x32xf32, #tpu.memory_space<vmem>>, %arg4: memref<1x16xf32, #tpu.memory_space<vmem>>, %arg5: memref<6x16xf32, #tpu.memory_space<vmem>>, %arg6: memref<6x1xf32, #tpu.memory_space<vmem>>, %arg7: memref<1x6x8x8xf32, #tpu.memory_space<vmem>>, %arg8: memref<8x16xf32, #tpu.memory_space<vmem>>, %arg9: memref<6x8xf32, #tpu.memory_space<vmem>>) attributes {dimension_semantics = [#tpu.dimension_semantics<parallel>, #tpu.dimension_semantics<arbitrary>], iteration_bounds = array<i64: 2, 1>, scalar_prefetch = 0 : i64, scratch_operands = 2 : i64, tpu.core_type = #tpu.core_type<tc>, window_params = [{transform_indices = @transform_0, window_bounds = array<i64: 1, 8, 32>}, {pipeline_mode = #tpu.pipeline_mode<synchronous>, transform_indices = @transform_1, window_bounds = array<i64: 16, 32>}, {pipeline_mode = #tpu.pipeline_mode<synchronous>, transform_indices = @transform_2, window_bounds = array<i64: 1, 16>}, {pipeline_mode = #tpu.pipeline_mode<synchronous>, transform_indices = @transform_3, window_bounds = array<i64: 6, 16>}, {pipeline_mode = #tpu.pipeline_mode<synchronous>, transform_indices = @transform_4, window_bounds = array<i64: 6, 1>}, {transform_indices = @transform_5, window_bounds = array<i64: 1, 6, 8, 8>}]} {
    %c0_i32 = arith.constant 0 : i32
    %0 = arith.cmpi eq, %arg1, %c0_i32 : i32
    %1 = arith.extui %0 : i1 to i32
    %c0_i32_0 = arith.constant 0 : i32
    %2 = arith.cmpi ne, %1, %c0_i32_0 : i32
    scf.if %2 {
      %c0_15 = arith.constant 0 : index
      %c0_16 = arith.constant 0 : index
      %c0_17 = arith.constant 0 : index
      %46 = vector.load %arg2[%c0_15, %c0_16, %c0_17] : memref<1x8x32xf32, #tpu.memory_space<vmem>>, vector<1x8x32xf32>
      %47 = vector.shape_cast %46 : vector<1x8x32xf32> to vector<8x32xf32>
      %c0_18 = arith.constant 0 : index
      %c0_19 = arith.constant 0 : index
      %48 = vector.load %arg3[%c0_18, %c0_19] : memref<16x32xf32, #tpu.memory_space<vmem>>, vector<16x32xf32>
      %cst_20 = arith.constant dense<0.000000e+00> : vector<8x16xf32>
      %49 = tpu.matmul %47, %48, %cst_20 {dimension_numbers = #tpu.dot_dimension_numbers<[1], [1], [0], [0], [0, 0, 1, 0], [], []>} : vector<8x32xf32>, vector<16x32xf32>, vector<8x16xf32> -> vector<8x16xf32>
      %c0_21 = arith.constant 0 : index
      %c0_22 = arith.constant 0 : index
      %50 = vector.load %arg4[%c0_21, %c0_22] : memref<1x16xf32, #tpu.memory_space<vmem>>, vector<1x16xf32>
      %51 = vector.broadcast %50 : vector<1x16xf32> to vector<8x16xf32>
      %52 = arith.addf %49, %51 : vector<8x16xf32>
      %c0_23 = arith.constant 0 : index
      %c0_24 = arith.constant 0 : index
      %53 = vector.load %arg8[%c0_23, %c0_24] : memref<8x16xf32, #tpu.memory_space<vmem>>, vector<8x16xf32>
      tpu.vector_store %arg8[%c0_23, %c0_24], %52 {strides = array<i32>} : memref<8x16xf32, #tpu.memory_space<vmem>>, vector<8x16xf32>,
      %c0_25 = arith.constant 0 : index
      %c0_26 = arith.constant 0 : index
      %54 = vector.load %arg5[%c0_25, %c0_26] : memref<6x16xf32, #tpu.memory_space<vmem>>, vector<6x16xf32>
      %55 = arith.mulf %52, %52 : vector<8x16xf32>
      %cst_27 = arith.constant dense<0.000000e+00> : vector<6x8xf32>
      %56 = tpu.matmul %54, %55, %cst_27 {dimension_numbers = #tpu.dot_dimension_numbers<[1], [1], [0], [0], [0, 0, 1, 0], [], []>} : vector<6x16xf32>, vector<8x16xf32>, vector<6x8xf32> -> vector<6x8xf32>
      %c0_28 = arith.constant 0 : index
      %c0_29 = arith.constant 0 : index
      %57 = vector.load %arg6[%c0_28, %c0_29] : memref<6x1xf32, #tpu.memory_space<vmem>>, vector<6x1xf32>
      %58 = vector.broadcast %57 : vector<6x1xf32> to vector<6x8xf32>
      %59 = arith.addf %56, %58 : vector<6x8xf32>
      %c0_30 = arith.constant 0 : index
      %c0_31 = arith.constant 0 : index
      %60 = vector.load %arg9[%c0_30, %c0_31] : memref<6x8xf32, #tpu.memory_space<vmem>>, vector<6x8xf32>
      tpu.vector_store %arg9[%c0_30, %c0_31], %59 {strides = array<i32>} : memref<6x8xf32, #tpu.memory_space<vmem>>, vector<6x8xf32>,
    } else {
    }
    %c0 = arith.constant 0 : index
    %c0_1 = arith.constant 0 : index
    %3 = vector.load %arg8[%c0, %c0_1] : memref<8x16xf32, #tpu.memory_space<vmem>>, vector<8x16xf32>
    %c8_i32 = arith.constant 8 : i32
    %4 = arith.muli %arg1, %c8_i32 : i32
    %5 = tpu.assume_multiple %4, 8 : i32
    %6 = arith.index_cast %5 : i32 to index
    %c0_2 = arith.constant 0 : index
    %7 = vector.load %arg8[%6, %c0_2] : memref<8x16xf32, #tpu.memory_space<vmem>>, vector<8x16xf32>
    %c0_3 = arith.constant 0 : index
    %c0_4 = arith.constant 0 : index
    %8 = vector.load %arg5[%c0_3, %c0_4] : memref<6x16xf32, #tpu.memory_space<vmem>>, vector<6x16xf32>
    %9 = arith.mulf %7, %7 : vector<8x16xf32>
    %10 = vector.shape_cast %8 : vector<6x16xf32> to vector<6x1x16xf32>
    %11 = vector.shape_cast %9 : vector<8x16xf32> to vector<1x8x16xf32>
    %12 = vector.broadcast %10 : vector<6x1x16xf32> to vector<6x8x16xf32>
    %13 = vector.broadcast %11 : vector<1x8x16xf32> to vector<6x8x16xf32>
    %14 = arith.mulf %12, %13 : vector<6x8x16xf32>
    %cst = arith.constant dense<0.000000e+00> : vector<6x8xf32>
    %15 = vector.multi_reduction <add>, %14, %cst [2] : vector<6x8x16xf32> to vector<6x8xf32>
    %16 = vector.shape_cast %15 : vector<6x8xf32> to vector<6x8x1xf32>
    %17 = vector.shape_cast %7 : vector<8x16xf32> to vector<1x8x16xf32>
    %cst_5 = arith.constant -2.000000e+00 : f32
    %18 = vector.broadcast %cst_5 : f32 to vector<6x16xf32>
    %19 = arith.mulf %18, %8 : vector<6x16xf32>
    %20 = vector.shape_cast %19 : vector<6x16xf32> to vector<6x1x16xf32>
    %21 = vector.broadcast %17 : vector<1x8x16xf32> to vector<6x8x16xf32>
    %22 = vector.broadcast %20 : vector<6x1x16xf32> to vector<6x8x16xf32>
    %23 = arith.mulf %21, %22 : vector<6x8x16xf32>
    %24 = vector.shape_cast %23 : vector<6x8x16xf32> to vector<48x16xf32>
    %cst_6 = arith.constant dense<0.000000e+00> : vector<48x8xf32>
    %25 = tpu.matmul %24, %3, %cst_6 {dimension_numbers = #tpu.dot_dimension_numbers<[1], [1], [0], [0], [0, 0, 1, 0], [], []>} : vector<48x16xf32>, vector<8x16xf32>, vector<48x8xf32> -> vector<48x8xf32>
    %26 = vector.shape_cast %25 : vector<48x8xf32> to vector<6x8x8xf32>
    %27 = vector.broadcast %16 : vector<6x8x1xf32> to vector<6x8x8xf32>
    %28 = arith.addf %26, %27 : vector<6x8x8xf32>
    %c0_7 = arith.constant 0 : index
    %c0_8 = arith.constant 0 : index
    %29 = vector.load %arg9[%c0_7, %c0_8] : memref<6x8xf32, #tpu.memory_space<vmem>>, vector<6x8xf32>
    %30 = vector.shape_cast %29 : vector<6x8xf32> to vector<6x1x8xf32>
    %31 = vector.broadcast %30 : vector<6x1x8xf32> to vector<6x8x8xf32>
    %32 = arith.addf %28, %31 : vector<6x8x8xf32>
    %cst_9 = arith.constant dense<0xFF800000> : vector<8x8xf32>
    %33 = vector.multi_reduction <maximumf>, %32, %cst_9 [0] : vector<6x8x8xf32> to vector<8x8xf32>
    %34 = vector.shape_cast %33 : vector<8x8xf32> to vector<1x8x8xf32>
    %35 = vector.broadcast %34 : vector<1x8x8xf32> to vector<6x8x8xf32>
    %36 = arith.subf %32, %35 : vector<6x8x8xf32>
    %37 = math.exp %36 : vector<6x8x8xf32>
    %cst_10 = arith.constant dense<0.000000e+00> : vector<8x8xf32>
    %38 = vector.multi_reduction <add>, %37, %cst_10 [0] : vector<6x8x8xf32> to vector<8x8xf32>
    %39 = vector.shape_cast %38 : vector<8x8xf32> to vector<1x8x8xf32>
    %40 = math.log %39 : vector<1x8x8xf32>
    %41 = vector.broadcast %40 : vector<1x8x8xf32> to vector<6x8x8xf32>
    %42 = arith.subf %36, %41 : vector<6x8x8xf32>
    %c0_11 = arith.constant 0 : index
    %c0_12 = arith.constant 0 : index
    %c0_13 = arith.constant 0 : index
    %c0_14 = arith.constant 0 : index
    %43 = vector.load %arg7[%c0_11, %c0_12, %c0_13, %c0_14] : memref<1x6x8x8xf32, #tpu.memory_space<vmem>>, vector<1x6x8x8xf32>
    %44 = vector.shape_cast %43 : vector<1x6x8x8xf32> to vector<6x8x8xf32>
    %45 = vector.shape_cast %42 : vector<6x8x8xf32> to vector<1x6x8x8xf32>
    tpu.vector_store %arg7[%c0_11, %c0_12, %c0_13, %c0_14], %45 {strides = array<i32>} : memref<1x6x8x8xf32, #tpu.memory_space<vmem>>, vector<1x6x8x8xf32>,
    return
  }
  func.func @transform_0(%arg0: i32, %arg1: i32) -> (i32, i32, i32) {
    %c0_i32 = arith.constant 0 : i32
    %c0_i32_0 = arith.constant 0 : i32
    %c0_i32_1 = arith.constant 0 : i32
    return %arg0, %c0_i32, %c0_i32_0 : i32, i32, i32
  }
  func.func @transform_1(%arg0: i32, %arg1: i32) -> (i32, i32) {
    %c0_i32 = arith.constant 0 : i32
    %c0_i32_0 = arith.constant 0 : i32
    %c0_i32_1 = arith.constant 0 : i32
    return %c0_i32, %c0_i32_0 : i32, i32
  }
  func.func @transform_2(%arg0: i32, %arg1: i32) -> (i32, i32) {
    %c0_i32 = arith.constant 0 : i32
    %c0_i32_0 = arith.constant 0 : i32
    %c0_i32_1 = arith.constant 0 : i32
    return %c0_i32, %c0_i32_0 : i32, i32
  }
  func.func @transform_3(%arg0: i32, %arg1: i32) -> (i32, i32) {
    %c0_i32 = arith.constant 0 : i32
    %c0_i32_0 = arith.constant 0 : i32
    %c0_i32_1 = arith.constant 0 : i32
    return %c0_i32, %c0_i32_0 : i32, i32
  }
  func.func @transform_4(%arg0: i32, %arg1: i32) -> (i32, i32) {
    %c0_i32 = arith.constant 0 : i32
    %c0_i32_0 = arith.constant 0 : i32
    %c0_i32_1 = arith.constant 0 : i32
    return %c0_i32, %c0_i32_0 : i32, i32
  }
  func.func @transform_5(%arg0: i32, %arg1: i32) -> (i32, i32, i32, i32) {
    %c0_i32 = arith.constant 0 : i32
    %c0_i32_0 = arith.constant 0 : i32
    %c0_i32_1 = arith.constant 0 : i32
    return %arg0, %c0_i32, %arg1, %c0_i32_0 : i32, i32, i32, i32
  }
}

</mosaic_0001>

<bundles_post_ra>
// kernel: tpu_custom_call.1
= control target key start
LH: loop header
LB: loop body
LE: loop exit
PB: predicated region body
PF: predicated region fallthrough
CT: control target
= control target key end

     0   :  { %s1628_s0 = inlined_call_operand.hbm [shape: f32[2,8,32], index: 0, kind: input, shape index: {}]   ;;  %s1629_s1 = inlined_call_operand.hbm [shape: f32[16,32], index: 1, kind: input, shape index: {}]   ;;  %s1630_s2 = inlined_call_operand.vmem [shape: f32[1,16], index: 2, kind: input, shape index: {}]   ;;  %s1631_s3 = inlined_call_operand.vmem [shape: f32[6,16], index: 3, kind: input, shape index: {}]   ;;  %s1632_s4 = inlined_call_operand.vmem [shape: f32[6,1], index: 4, kind: input, shape index: {}]   ;;  %s1633_s5 = inlined_call_operand.hbm [shape: f32[2,6,8,8], index: 5, kind: output, shape index: {}]  }
   0x1   :  { %1636 = sst [smem:[#allocation14_spill]] %s1629_s1 }
   0x2   :  { %10 = vsyncpa [#allocation5], 0 }
   0x3   :  { %12 = vsyncpa [#allocation5 + $0x1], 0 }
   0x4   :  { %13 = vsyncpa [#allocation8], 0 }
   0x5   :  { %14 = vsyncpa [#allocation6], 0 }
   0x6   :  { %16 = vsyncpa [#allocation6 + $0x1], 0  ;;  %s1359_s18 = smov 0   ;;  %s1361_s19 = smov 0  }
   0x7   :  { %s1363_s20 = smov 0   ;;  %s1365_s21 = smov 0  }
   0x8   :  { %s1367_s22 = smov 0   ;;  %s1369_s23 = smov 0  }
   0x9 LB: > { %s1017_s24 = sadd.s32 4294967295, %s1316_s23   ;;  %s1018_s25 = sadd.s32 4294967294, %s1316_s23   ;;  %s1316_s23 = sphi %s1369_s23, %s22_s23   ;;  %s1312_s22 = sphi %s1367_s22, %s1656_s22   ;;  %s1308_s21 = sphi %s1365_s21, %s1655_s21   ;;  %s1304_s20 = sphi %s1363_s20, %s1654_s20   ;;  %s1300_s19 = sphi %s1361_s19, %s1653_s19   ;;  %s1296_s18 = sphi %s1359_s18, %s1652_s18  }
   0xa   : > { %p54_p0 = scmp.ne.s32.totalorder %s1300_s19, %s1296_s18  ;;  %p1393_p1 = scmp.eq.s32.totalorder %s1017_s24, 0 }
   0xb   : > { %p1397_p2 = scmp.eq.s32.totalorder %s1017_s24, 1  ;;  %p170_p3 = scmp.eq.s32.totalorder %s1018_s25, 1 }
   0xc   : > { %p1403_p4 = por %p1393_p1, %p54_p0  ;;  %p1019_p5 = scmp.ge.s32.totalorder %s1316_s23, 1 }
   0xd   : > { %p1408_p6 = por %p170_p3, %p54_p0  ;;  %p177_p7 = scmp.lt.s32.totalorder %s1316_s23, 3 }
   0xe   : > { %s1639_s28 = scalar_select %p1403_p4, 1, 0 }
   0xf   : > { %s1640_s29 = scalar_select %p1408_p6, 1, 0 }
  0x10   : > { %p1413_p8 = pnand %p1019_p5, %p177_p7  ;;  %s1318_s6 = smov [#allocation7]  }
  0x11   : > { %s189_s7 = sshll.u32 %s1318_s6, 4  ;;  %s34_s9 = sadd.s32 1, %s1312_s22  ;;  %s190_s7 = int_to_ptr.vmem [resolvable:$true] %s189_s7 }
  0x12   : > { %p1088_p9 = pneg %p1413_p8  ;;  %s1189_s10 = scalar_lea.vmem %s190_s7, 256 }
  0x13   : > { %p1190_p13 = scmp.ne.s32.totalorder %s190_s7, %s1189_s10  ;;  %p1197_p5 = scmp.lt.s32.totalorder %s190_s7, %s190_s7 }
  0x14   : > { %p1422_p11 = pnand %p1088_p9, %p1393_p1  ;;  %p1198_p7 = scmp.lt.s32.totalorder %s1189_s10, %s1189_s10 }
  0x16   : > { %p1180_p12 = pneg %p1422_p11  ;;  %p1199_p6 = por %p1198_p7, %p1197_p5 }
  0x18   : > { %p1192_p0 = pnand %p1190_p13, %p1180_p12 }
  0x1a   : > { %p1193_p3 = pneg %p1192_p0 }
  0x1c   : > { %p1200_p4 = pnand %p1199_p6, %p1193_p3 }
  0x1e   : > { %1203 = shalt.err (!%p1200_p4)
}
  0x1f   : > { %s1319_s11 = smov 128   ;;  %s1320_s12 = smov 8  }
  0x20   : > { %s1643_s1 = sld [smem:[#allocation14_spill]]  ;;  %p36_p6 = scmp.ge.s32.totalorder %s34_s9, 2 }
  0x21   : > { %s41_s15 = sadd.s32 1, %s1304_s20  ;;  %p48_p4 = scmp.ne.s32.totalorder %s1304_s20, %s1300_s19 }
  0x22   : > { %p49_p9 = scmp.eq.s32.totalorder %s1316_s23, 0  ;;  %s1658_s9 = smov (%p36_p6, %s34_s9), 0 }
  0x23   : > { %1644 = sst [smem:[#allocation13_spill]] %s1658_s9  ;;  %p1446_p13 = por %p1397_p2, %p48_p4 }
  0x24   : > { %p1440_p12 = por %p49_p9, %p48_p4  ;;  %s38_s24 = ssub.s32 %s1312_s22, %s1658_s9 }
  0x25   : > { %p1101_p0 = scmp.lt.s32.totalorder %s1316_s23, 2  ;;  %s212_s25 = sand.u32 1, %s1304_s20  }
  0x26   : > { %1091 = dma.hbm_to_vmem [thread:$0]  (!%p1422_p11), %s1643_s1, 256, %s190_s7, [#allocation8], %s1319_s11, %s1319_s11, %s1320_s12  }
  0x27   : > { %p39_p11 = scmp.eq.s32.totalorder %s38_s24, 0  ;;  %s1022_s6 = sshll.u32 %s212_s25, 3 }
  0x28   : > { %s1023_s8 = sshll.u32 %s1312_s22, 7  ;;  %s216_s13 = scalar_lea.vmem [#allocation4], %s1022_s6 }
  0x29   : > { %s1455_s7 = scalar_select %p39_p11, %s1304_s20, %s41_s15  }
  0x2a   : > { %s221_s12 = scalar_lea.hbm %s1628_s0, %s1023_s8  ;;  %s223_s14 = sshll.u32 %s216_s13, 4  ;;  %s224_s14 = int_to_ptr.vmem [resolvable:$true] %s223_s14 }
  0x2b   : > { %p1463_p2 = pnand %p1101_p0, %p1440_p12  ;;  %s213_s1 = scalar_lea.sflag [#allocation5], %s212_s25 }
  0x2c   : > { %s1217_s24 = scalar_lea.vmem %s224_s14, 128  ;;  %s1321_s15 = smov [#allocation4]  }
  0x2d   : > { %p1206_p3 = pneg %p1463_p2  ;;  %p1218_p5 = scmp.ne.s32.totalorder %s224_s14, %s1217_s24 }
  0x2e   : > { %s1222_s9 = sshll.u32 %s1321_s15, 4  ;;  %s1223_s9 = int_to_ptr.vmem [resolvable:$false] %s1222_s9 }
  0x2f   : > { %p1220_p7 = pnand %p1218_p5, %p1206_p3  ;;  %s1224_s8 = scalar_lea.vmem %s1223_s9, 256 }
  0x30   : > { %p1225_p4 = scmp.lt.s32.totalorder %s224_s14, %s1223_s9  ;;  %p1226_p9 = scmp.lt.s32.totalorder %s1224_s8, %s1217_s24 }
  0x31   : > { %p1221_p6 = pneg %p1220_p7 }
  0x32   : > { %p1227_p11 = por %p1226_p9, %p1225_p4 }
  0x34   : > { %p1228_p10 = pnand %p1227_p11, %p1221_p6 }
  0x36   : > { %1231 = shalt.err (!%p1228_p10)
}
  0x37   : > { %1095 = dma.hbm_to_vmem [thread:$0]  (!%p1463_p2), %s221_s12, 128, %s224_s14, %s213_s1  }
  0x38   : > { %232 = sbr.rel (%p1413_p8) target bundleno = 560 (0x230), region = 40  ;;  %s1474_s16 = sand.u32 (!%p1413_p8), 1, %s1300_s19  }
  0x39   : > { %s1025_s25 = sshll.u32 (!%p1413_p8), %s1474_s16, 3  ;;  %s235_s6 = scalar_lea.sflag (!%p1413_p8), [#allocation5], %s1474_s16 }
  0x3a   : > { %s238_s10 = scalar_lea.vmem (!%p1413_p8), [#allocation4], %s1025_s25  ;;  %p1648_p12 = scmp.ne.s32.totalorder (!%p1413_p8), %s1639_s28, 0 }
  0x3d   : > { %1283 = dma.done.wait (%p1648_p12), %s235_s6, 128  }
  0x3e   : > { %1285 = vsyncadd (%p1648_p12), %s235_s6, 4294967168 }
  0x3f   : > { %1287 = dma.done.wait (%p1393_p1), [#allocation8], 256  }
  0x40   : > { %1289 = vsyncadd (%p1393_p1), [#allocation8], 4294967040  ;;  %v1322_v0 = vmov 0.0   ;;  %vm1323_vm0 = vmmov 0   ;;  %v1324_v1 = vmov 0   ;;  %vm283_vm1 = vcmask 261120  }
  0x41   : > { %1055 = vmatprep.subr.mxu0 %v1322_v0  ;;  %1059 = vmatprep.mubr.msk.f32.mxu0 %vm1323_vm0, %v1322_v0  ;;  %v275_v2 = vld [vmem:[#allocation7 + $0x8] sm:$0xff]  ;;  %v367_v3 = vld [vmem:[%s1632_s4] sm:$0x3f]  ;;  %v273_v5 = vld [vmem:[%s238_s10] sm:$0xff]  ;;  %v1325_v6 = vmov 1966171168   ;;  %v462_v8 = vlaneseq }
  0x42   : > { %1161 = vset.pattern.permute.xlu0 %v1324_v1  ;;  %1056 = vmatpush3.xpose.msk.msra.mxu0 %vm283_vm1, %v275_v2  ;;  %v274_v4 = vld [vmem:[#allocation7] sm:$0xff]  ;;  %v460_v7 = vunpack.c.l.s4 %v1325_v6  ;;  %vm363_vm2 = vcmask 130048   ;;  %vm449_vm3 = vcmask 62464   ;;  %vm852_vm4 = vcmask 64512   ;;  %s1078_s14 = smul.u32 48, %s1474_s16  ;;  %s1326_s1 = smov [#allocation9]  }
  0x43   : > { %1057 = vmatprep.subr.mxu0 %v1322_v0  ;;  %370 = vperm.xlu0 %1161, %v367_v3   ;;  %v463_v10 = vshrl.u32 %v462_v8, 7  ;;  %v455_v11 = vld [vmem:[%s1631_s3] sm:$0x3f]  ;;  %s1079_s27 = smul.u32 768, %s1308_s21  ;;  %s908_s21 = scalar_lea.sflag [#allocation6], %s1474_s16 }
  0x44   : > { %v461_v9 = vunpack.c.0.s8 %v460_v7  ;;  %v560_v13 = vmul.f32 -2.0, %v455_v11  ;;  %v1027_v15 = vld [vmem:[%s1630_s2] ss:$0 sm:$0xff]  ;;  %v458_v16 = vcombine.high %v455_v11, %v455_v11  ;;  %s268_s24 = scalar_lea.vmem [#allocation9], %s1078_s14  ;;  %s1236_s30 = sshll.u32 %s1326_s1, 4  ;;  %s1237_s30 = int_to_ptr.vmem [resolvable:$false] %s1236_s30 }
  0x45   : > { %v1502_v26 = vsub.s32 0, %v463_v10  ;;  %v365_v29 = vld [vmem:[%s1631_s3] sm:$0x3f]  ;;  %s922_s15 = sshll.u32 %s268_s24, 4  ;;  %s1572_s6 = scalar_lea.hbm %s1633_s5, %s1079_s27  ;;  %s1574_s15 = int_to_ptr.vmem [resolvable:$true] %s922_s15 }
  0x46   : > { %1058 = vmatpush3.xpose.msk.msra.mxu0 %vm283_vm1, %v274_v4  ;;  %v1492_v12 = vsub.s32 %v461_v9, %v463_v10  ;;  %v562_v19 = vcombine.high %v560_v13, %v560_v13  ;;  %s1232_s10 = scalar_lea.vmem %s1574_s15, 768  ;;  %s1238_s26 = scalar_lea.vmem %s1237_s30, 1536 }
  0x47   : > { %1062 = vmatprep.subr.mxu0 %v1322_v0  ;;  %p1233_p1 = scmp.ne.s32.totalorder %s1574_s15, %s1232_s10  ;;  %p1239_p0 = scmp.lt.s32.totalorder %s1574_s15, %s1237_s30 }
  0x48   : > { %v569_v14 = vrot.slane %v560_v13, %v1492_v12  ;;  %v465_v17 = vrot.slane %v455_v11, %v1492_v12  ;;  %v472_v24 = vrot.slane %v458_v16, %v1492_v12  ;;  %v576_v28 = vrot.slane %v562_v19, %v1492_v12  ;;  %p1240_p2 = scmp.lt.s32.totalorder %s1238_s26, %s1232_s10 }
  0x49   : > { %1060 = vmatmul.mubr.msk.f32.vlgmr.msra.gmra.mxu0 %vm283_vm1, %v273_v5  ;;  %p1234_p8 = pnand %p1233_p1, %p1446_p13 }
  0x4a   : > { %1064 = vmatprep.mubr.msk.f32.mxu0 %vm1323_vm0, %v1322_v0  ;;  %v577_v21 = vcombine.high %v569_v14, %v569_v14  ;;  %v585_v23 = vrot.slane %v569_v14, %v1492_v12  ;;  %v473_v27 = vcombine.high %v465_v17, %v465_v17  ;;  %v474_v32 = vcombine.high %v472_v24, %v472_v24  ;;  %p1241_p3 = por %p1240_p2, %p1239_p0 }
  0x4b   : > { %v481_v35 = vrot.slane %v465_v17, %v1492_v12  ;;  %v488_v36 = vrot.slane %v472_v24, %v1492_v12  ;;  %v578_v37 = vcombine.high %v576_v28, %v576_v28  ;;  %v592_v43 = vrot.slane %v576_v28, %v1492_v12  ;;  %p1235_p10 = pneg %p1234_p8 }
  0x4c   : > { %v599_v30 = vrot.slane %v577_v21, %v1492_v12  ;;  %v607_v31 = vcombine.high %v585_v23, %v585_v23  ;;  %v612_v33 = vrot.slane %v585_v23, %v1502_v26  ;;  %v495_v34 = vrot.slane %v473_v27, %v1492_v12 }
  0x4d   : > { %v508_v40 = vrot.slane %v481_v35, %v1502_v26  ;;  %v502_v44 = vrot.slane %v474_v32, %v1492_v12  ;;  %v524_v48 = vrot.slane %v488_v36, %v1502_v26  ;;  %v606_v49 = vrot.slane %v578_v37, %v1492_v12  ;;  %p1242_p5 = pnand %p1241_p3, %p1235_p10 }
  0x4e   : > { %v616_v38 = vrot.slane %v599_v30, %v1502_v26  ;;  %v512_v39 = vrot.slane %v495_v34, %v1502_v26  ;;  %v608_v41 = vcombine.high %v599_v30, %v599_v30  ;;  %v620_v47 = vrot.slane %v607_v31, %v1502_v26 }
  0x4f   : > { %v628_v54 = vrot.slane %v592_v43, %v1502_v26  ;;  %v528_v55 = vrot.slane %v502_v44, %v1502_v26  ;;  %v503_v56 = vcombine.high %v481_v35, %v481_v35  ;;  %v632_v62 = vrot.slane %v606_v49, %v1502_v26 }
  0x50   : > { %v624_v53 = vrot.slane %v608_v41, %v1502_v26  ;;  %v504_v3 = vcombine.high %v495_v34, %v495_v34 }
  0x51   : > { %v516_v2 = vrot.slane %v503_v56, %v1502_v26 }
  0x52   : > { %v520_v7 = vrot.slane %v504_v3, %v1502_v26 }
  0xbe   : > { %v371_v13 = vpop.permute.xlu0 %370 }
 0x109   : > { %v359_v18 = vpop.f32.mrf.mxu0 }
 0x10a   : > { %v360_v20 = vadd.f32 %v1027_v15, %v359_v18 }
 0x10b   : > { %v1061_v22 = vpop.f32.mrf.mxu0 }
 0x10c   : > { %364 = vst.msk [vmem:[#allocation2] sm:$0xff] %vm363_vm2, %v360_v20  ;;  %v366_v25 = vmul.f32 %v360_v20, %v360_v20 }
 0x10e   : > { %1063 = vmatpush3.xpose.msk.msra.mxu0 %vm363_vm2, %v366_v25 }
 0x111   : > { %1065 = vmatmul.mubr.msk.f32.vlgmr.msra.gmra.mxu0 %vm363_vm2, %v365_v29 }
 0x113   : > { %v451_v42 = vld [vmem:[#allocation2] sm:$0xff] }
 0x114   : > { %1067 = vmatprep.subr.msk.mxu1 %vm363_vm2, %v451_v42  ;;  %v639_v45 = vmul.f32 %v612_v33, %v451_v42  ;;  %v456_v46 = vmul.f32 %v451_v42, %v451_v42  ;;  %v640_v50 = vmul.f32 %v616_v38, %v451_v42  ;;  %v641_v59 = vmul.f32 %v620_v47, %v451_v42 }
 0x115   : > { %1068 = vmatpush3.xpose.msk.msra.mxu1 %vm363_vm2, %v451_v42  ;;  %v642_v61 = vmul.f32 %v624_v53, %v451_v42  ;;  %v643_v63 = vmul.f32 %v628_v54, %v451_v42  ;;  %v644_v4 = vmul.f32 %v632_v62, %v451_v42 }
 0x116   : > { %1069 = vmatprep.mubr.msk.f32.mxu1 %vm363_vm2, %v639_v45  ;;  %v536_v51 = vmul.f32 %v512_v39, %v456_v46  ;;  %v535_v52 = vmul.f32 %v508_v40, %v456_v46  ;;  %v539_v60 = vmul.f32 %v524_v48, %v456_v46  ;;  %v540_v1 = vmul.f32 %v528_v55, %v456_v46 }
 0x117   : > { %v537_v6 = vmul.f32 %v516_v2, %v456_v46  ;;  %v538_v9 = vmul.f32 %v520_v7, %v456_v46 }
 0x118   : > { %1070 = vmatmul.mubr.msk.f32.vlgmr.msra.gmra.mxu1 %vm363_vm2, %v640_v50  ;;  %v545_v57 = vsel %vm363_vm2, %v536_v51, 0.0  ;;  %v542_v58 = vsel %vm363_vm2, %v535_v52, 0.0  ;;  %v554_v0 = vsel %vm363_vm2, %v539_v60, 0.0  ;;  %v557_v5 = vsel %vm363_vm2, %v540_v1, 0.0 }
 0x119   : > { %546 = vadd.xlane.f32.xlu1 %v545_v57  ;;  %543 = vadd.xlane.f32.xlu0 %v542_v58  ;;  %v548_v8 = vsel %vm363_vm2, %v537_v6, 0.0  ;;  %v551_v10 = vsel %vm363_vm2, %v538_v9, 0.0 }
 0x11a   : > { %1072 = vmatprep.mubr.msk.f32.mxu1 %vm363_vm2, %v641_v59 }
 0x11c   : > { %1073 = vmatmul.mubr.msk.f32.gmra.mxu1 %vm363_vm2, %v642_v61 }
 0x11d   : > { %555 = vadd.xlane.f32.xlu1 %v554_v0  ;;  %1075 = vmatprep.mubr.msk.f32.mxu1 %vm363_vm2, %v643_v63 }
 0x120   : > { %1076 = vmatmul.mubr.msk.f32.gmra.mxu1 %vm363_vm2, %v644_v4 }
 0x121   : > { %558 = vadd.xlane.f32.xlu1 %v557_v5 }
 0x125   : > { %549 = vadd.xlane.f32.xlu1 %v548_v8 }
 0x129   : > { %552 = vadd.xlane.f32.xlu1 %v551_v10 }
 0x1a2   : > { %v547_v11 = vpop.xlane.xlu1 %546  ;;  %v544_v27 = vpop.xlane.xlu0 %543 }
 0x1a6   : > { %v556_v14 = vpop.xlane.xlu1 %555 }
 0x1aa   : > { %v559_v18 = vpop.xlane.xlu1 %558 }
 0x1ae   : > { %v550_v25 = vpop.xlane.xlu1 %549 }
 0x1b2   : > { %v553_v44 = vpop.xlane.xlu1 %552 }
 0x1d1   : > { %v445_v15 = vpop.f32.mrf.mxu0 }
 0x1d2   : > { %v446_v16 = vadd.f32 %v445_v15, %v371_v13 }
 0x1d3   : > { %v1066_v17 = vpop.f32.mrf.mxu0 }
 0x1d4   : > { %450 = vst.msk [vmem:[#allocation3] sm:$0x3f] %vm449_vm3, %v446_v16 }
 0x1d8   : > { %v1071_v19 = vpop.f32.mrf.mxu1 }
 0x1d9   : > { %v762_v39 = vadd.f32 %v1071_v19, %v547_v11 }
 0x1da   : > { %v732_v20 = vpop.f32.mrf.mxu1 }
 0x1db   : > { %v767_v21 = vld [vmem:[#allocation3] sm:$0x3f]  ;;  %v761_v32 = vadd.f32 %v732_v20, %v544_v27 }
 0x1dc   : > { %v776_v22 = vrot.slane %v767_v21, %v1492_v12  ;;  %v1074_v23 = vpop.f32.mrf.mxu1  ;;  %v769_v24 = vcombine.high %v767_v21, %v767_v21 }
 0x1dd   : > { %v764_v49 = vadd.f32 %v1074_v23, %v553_v44 }
 0x1de   : > { %v784_v28 = vcombine.high %v776_v22, %v776_v22  ;;  %v792_v29 = vrot.slane %v776_v22, %v1492_v12  ;;  %v742_v30 = vpop.f32.mrf.mxu1  ;;  %v783_v31 = vrot.slane %v769_v24, %v1492_v12 }
 0x1df   : > { %v763_v51 = vadd.f32 %v742_v30, %v550_v25 }
 0x1e0   : > { %v806_v33 = vrot.slane %v784_v28, %v1492_v12  ;;  %v819_v34 = vrot.slane %v792_v29, %v1502_v26  ;;  %v814_v35 = vcombine.high %v792_v29, %v792_v29  ;;  %v1077_v36 = vpop.f32.mrf.mxu1  ;;  %v785_v37 = vcombine.high %v783_v31, %v783_v31 }
 0x1e1   : > { %v799_v38 = vrot.slane %v783_v31, %v1492_v12  ;;  %v766_v53 = vadd.f32 %v1077_v36, %v559_v18 }
 0x1e2   : > { %v823_v40 = vrot.slane %v806_v33, %v1502_v26  ;;  %v846_v41 = vadd.f32 %v819_v34, %v761_v32  ;;  %v815_v42 = vcombine.high %v806_v33, %v806_v33  ;;  %v752_v43 = vpop.f32.mrf.mxu1  ;;  %v827_v45 = vrot.slane %v814_v35, %v1502_v26 }
 0x1e3   : > { %v813_v46 = vrot.slane %v785_v37, %v1492_v12  ;;  %v765_v47 = vadd.f32 %v752_v43, %v556_v14  ;;  %v835_v48 = vrot.slane %v799_v38, %v1502_v26 }
 0x1e4   : > { %v831_v50 = vrot.slane %v815_v42, %v1502_v26  ;;  %v847_v52 = vadd.f32 %v823_v40, %v762_v39  ;;  %v853_v57 = vsel %vm852_vm4, %v846_v41, -inf  ;;  %v848_v58 = vadd.f32 %v827_v45, %v763_v51 }
 0x1e5   : > { %v839_v54 = vrot.slane %v813_v46, %v1502_v26  ;;  %v850_v55 = vadd.f32 %v835_v48, %v765_v47 }
 0x1e6   : > { %v849_v56 = vadd.f32 %v831_v50, %v764_v49  ;;  %v854_v61 = vsel %vm852_vm4, %v847_v52, -inf  ;;  %v855_v1 = vsel %vm852_vm4, %v848_v58, -inf }
 0x1e7   : > { %v851_v59 = vadd.f32 %v839_v54, %v766_v53  ;;  %v857_v12 = vsel %vm852_vm4, %v850_v55, -inf }
 0x1e8   : > { %v858_v60 = vmax.f32 %v853_v57, %v857_v12  ;;  %v856_v62 = vsel %vm852_vm4, %v849_v56, -inf }
 0x1e9   : > { %v859_v63 = vsel %vm852_vm4, %v851_v59, -inf  ;;  %v862_v2 = vmax.f32 %v855_v1, %v856_v62 }
 0x1ea   : > { %v860_v0 = vmax.f32 %v854_v61, %v859_v63 }
 0x1ec   : > { %v861_v26 = vmax.f32 %v858_v60, %v860_v0 }
 0x1ee   : > { %v863_v3 = vmax.f32 %v861_v26, %v862_v2 }
 0x1f0   : > { %v864_v4 = vsub.f32 %v846_v41, %v863_v3  ;;  %v865_v5 = vsub.f32 %v847_v52, %v863_v3  ;;  %v866_v6 = vsub.f32 %v848_v58, %v863_v3  ;;  %v867_v7 = vsub.f32 %v849_v56, %v863_v3 }
 0x1f1   : > { %v868_v8 = vsub.f32 %v850_v55, %v863_v3  ;;  %v869_v13 = vsub.f32 %v851_v59, %v863_v3 }
 0x1f2   : > { %v870_v9 = vmul.f32 1.442695, %v864_v4  ;;  %v872_v10 = vmul.f32 1.442695, %v865_v5  ;;  %v874_v11 = vmul.f32 1.442695, %v866_v6 }
 0x1f3   : > { %v876_v14 = vmul.f32 1.442695, %v867_v7  ;;  %v878_v15 = vmul.f32 1.442695, %v868_v8  ;;  %v880_v16 = vmul.f32 1.442695, %v869_v13 }
 0x1f4   : > { %1164 = vpow2.f32 %v870_v9 }
 0x1f5   : > { %1166 = vpow2.f32 %v872_v10 }
 0x1f6   : > { %1168 = vpow2.f32 %v874_v11 }
 0x1f7   : > { %1170 = vpow2.f32 %v876_v14 }
 0x1f8   : > { %1172 = vpow2.f32 %v878_v15 }
 0x1f9   : > { %1174 = vpow2.f32 %v880_v16 }
 0x201   : > { %v1165_v17 = vpop.eup %1164 }
 0x202   : > { %v1167_v18 = vpop.eup %1166  ;;  %v882_v19 = vsel %vm852_vm4, %v1165_v17, 0.0 }
 0x203   : > { %v1169_v20 = vpop.eup %1168  ;;  %v883_v21 = vsel %vm852_vm4, %v1167_v18, 0.0 }
 0x204   : > { %v1171_v22 = vpop.eup %1170  ;;  %v884_v23 = vadd.f32 %v883_v21, %v882_v19  ;;  %v885_v24 = vsel %vm852_vm4, %v1169_v20, 0.0 }
 0x205   : > { %v1173_v25 = vpop.eup %1172  ;;  %v887_v28 = vsel %vm852_vm4, %v1171_v22, 0.0 }
 0x206   : > { %v886_v27 = vadd.f32 %v885_v24, %v884_v23  ;;  %v1175_v29 = vpop.eup %1174  ;;  %v889_v31 = vsel %vm852_vm4, %v1173_v25, 0.0 }
 0x207   : > { %v891_v33 = vsel %vm852_vm4, %v1175_v29, 0.0 }
 0x208   : > { %v888_v30 = vadd.f32 %v887_v28, %v886_v27 }
 0x20a   : > { %v890_v32 = vadd.f32 %v889_v31, %v888_v30 }
 0x20c   : > { %v892_v34 = vadd.f32 %v891_v33, %v890_v32 }
 0x20e   : > { %1176 = vlog2.f32 %v892_v34 }
 0x21b   : > { %v1177_v35 = vpop.eup %1176 }
 0x21c   : > { %v894_v36 = vmul.f32 0.6931472, %v1177_v35 }
 0x21e   : > { %v895_v37 = vsub.f32 %v864_v4, %v894_v36  ;;  %v896_v38 = vsub.f32 %v865_v5, %v894_v36  ;;  %v897_v39 = vsub.f32 %v866_v6, %v894_v36  ;;  %v898_v40 = vsub.f32 %v867_v7, %v894_v36 }
 0x21f   : > { %v899_v41 = vsub.f32 %v868_v8, %v894_v36  ;;  %v900_v42 = vsub.f32 %v869_v13, %v894_v36 }
 0x220   : > { %901 = vst.msk [vmem:[%s268_s24] sm:$0xff] %vm852_vm4, %v895_v37  ;;  %902 = vst.msk [vmem:[%s268_s24 + $0x8] sm:$0xff] %vm852_vm4, %v896_v38 }
 0x221   : > { %903 = vst.msk [vmem:[%s268_s24 + $0x10] sm:$0xff] %vm852_vm4, %v897_v39  ;;  %904 = vst.msk [vmem:[%s268_s24 + $0x18] sm:$0xff] %vm852_vm4, %v898_v40 }
 0x222   : > { %905 = vst.msk [vmem:[%s268_s24 + $0x20] sm:$0xff] %vm852_vm4, %v899_v41  ;;  %906 = vst.msk [vmem:[%s268_s24 + $0x28] sm:$0xff] %vm852_vm4, %v900_v42 }
 0x223   : > { %1245 = shalt.err (!%p1242_p5)
}
 0x224   : > { %s1246_s28 = scalar_lea.hbm %s1572_s6, 768  ;;  %s1250_s12 = scalar_lea.hbm %s1633_s5, 1536 }
 0x225   : > { %p1247_p7 = scmp.ne.s32.totalorder %s1572_s6, %s1246_s28  ;;  %p1251_p9 = scmp.lt.s32.totalorder %s1572_s6, %s1633_s5 }
 0x226   : > { %p1252_p11 = scmp.lt.s32.totalorder %s1250_s12, %s1246_s28 }
 0x227   : > { %p1248_p6 = pnand %p1247_p7, %p1446_p13 }
 0x228   : > { %p1253_p12 = por %p1252_p11, %p1251_p9 }
 0x229   : > { %p1249_p4 = pneg %p1248_p6 }
 0x22b   : > { %p1254_p1 = pnand %p1253_p12, %p1249_p4 }
 0x22d   : > { %1257 = shalt.err (!%p1254_p1)
}
 0x22e   : > { %s1327_s27 = smov 128   ;;  %s1328_s24 = smov 8  }
 0x22f   : > { %1086 = dma.vmem_to_hbm [thread:$0]  (%p1446_p13), %s1574_s15, 768, %s1572_s6, %s908_s21, %s1327_s27, %s1327_s27, %s1328_s24  }
 0x230 PF: > { %s937_s8 = sand.u32 1, %s1296_s18   ;;  %p1649_p8 = scmp.ne.s32.totalorder %s1640_s29, 0 }
 0x231   : > { %p1650_p10 = scmp.ge.s32.totalorder %s1316_s23, 2  ;;  %s938_s25 = scalar_lea.sflag [#allocation6], %s937_s8 }
 0x233   : > { %p1097_p0 = pnand %p1650_p10, %p1649_p8 }
 0x235   : > { %p1098_p2 = pneg %p1097_p0 }
 0x237   : > { %1291 = dma.done.wait (%p1098_p2), %s938_s25, 768  }
 0x238   : > { %1293 = vsyncadd (%p1098_p2), %s938_s25, 4294966528  ;;  %s22_s23 = sadd.s32 1, %s1316_s23   ;;  %s1651_s17 = sld [smem:[#allocation13_spill]] }
 0x239   : > { %p19_p3 = scmp.ge.s32.totalorder %s22_s23, 4   ;;  %s1652_s18 = smov %s1300_s19 }
 0x23a   : > { %s1653_s19 = smov %s1304_s20  ;;  %s1654_s20 = smov %s1455_s7 }
 0x23b   : > { %s1655_s21 = smov %s1312_s22  ;;  %21 = sbr.rel (!%p19_p3) target bundleno = 9 (0x9), region = 94 }
 0x23e   : > { %s1656_s22 = smov %s1651_s17 }
 0x240   :  { %943 = vsyncpa [#allocation5], 1 }
 0x241   :  { %945 = vsyncpa [#allocation5 + $0x1], 1 }
 0x242   :  { %946 = vsyncpa [#allocation8], 1 }
 0x243   :  { %947 = vsyncpa [#allocation6], 1 }
 0x244   :  { %949 = vsyncpa [#allocation6 + $0x1], 1 }

</bundles_post_ra>
